<compile_context>
chip_gen: v5e
topology: v5e:2x2
jax: 0.10.0
libtpu: 0.0.40
codegen_flags: <defaults>
</compile_context>

<pallas_src>
import jax
import jax.numpy as jnp
from jax.experimental import pallas as pl
from jax.experimental.pallas import tpu as pltpu

FOCAL_ALPHA = 0.25
LANES = 128
_PAD_LOGIT = -1.0e4      # sigmoid(pad)==0 exactly -> zero focal/_neg_loss term


def _lane_dense(x, pad_value):
    """Flatten to (rows, 128) so every vreg lane carries useful data."""
    flat = jnp.ravel(x)
    n = flat.shape[0]
    rows = max(1, (n + LANES - 1) // LANES)
    padded = rows * LANES
    if padded != n:
        flat = jnp.concatenate(
            [flat, jnp.full((padded - n,), pad_value, dtype=flat.dtype)])
    return flat.reshape(rows, LANES)


# ---------------------------------------------------------------------------
# Single fused kernel: focal loss + cardinality + verb _neg_loss + box losses
# ---------------------------------------------------------------------------
def _criterion_kernel(obj3_ref, ox_ref, ot_ref, vx_ref, vt_ref,
                      box_ref, valid_ref, lens_ref, out_ref):
    f32 = jnp.float32

    # ---- sigmoid focal loss on the lane-dense slab (raw sum) ----
    x = ox_ref[...].astype(f32)
    t = ot_ref[...].astype(f32)
    e = jnp.exp(-jnp.abs(x))                      # single EUP exp, shared
    log1pe = jnp.log1p(e)
    ce = jnp.maximum(x, 0.0) - x * t + log1pe     # BCE-with-logits
    inv_1pe = pl.reciprocal(1.0 + e, approx=True)  # EUP vrcp (cheap slot)
    prob = jnp.where(x >= 0.0, inv_1pe, e * inv_1pe)
    p_t = prob * t + (1.0 - prob) * (1.0 - t)
    q = 1.0 - p_t                                  # gamma=2 -> explicit square
    alpha_t = FOCAL_ALPHA * t + (1.0 - FOCAL_ALPHA) * (1.0 - t)
    out_ref[0] = jnp.sum(alpha_t * ce * q * q)

    # ---- cardinality: argmax != C-1  <=>  max(non-bg logits) >= bg logit ----
    xo = obj3_ref[...].astype(f32)                 # (B, Q, C)
    B = xo.shape[0]
    c_bg = xo.shape[-1] - 1
    bg = xo[:, :, c_bg:c_bg + 1]                   # (B, Q, 1)
    fg_max = jnp.max(xo[:, :, :c_bg], axis=-1, keepdims=True)
    not_bg = (fg_max >= bg).astype(f32)            # (B, Q, 1)
    err = f32(0.0)
    for b in range(B):                             # B is tiny & static
        card_b = jnp.sum(not_bg[b:b + 1])
        err = err + jnp.abs(card_b - lens_ref[b])
    out_ref[1] = err / f32(B)

    # ---- verb labels: CornerNet _neg_loss, softplus form (no log(sigmoid)) --
    v = vx_ref[...].astype(f32)
    gt = vt_ref[...].astype(f32)
    ev = jnp.exp(-jnp.abs(v))
    log1pev = jnp.log1p(ev)
    inv_v = pl.reciprocal(1.0 + ev, approx=True)
    pred = jnp.where(v >= 0.0, inv_v, ev * inv_v)  # sigmoid(v)
    log_p = jnp.minimum(v, 0.0) - log1pev          # log(sigmoid(v)), finite
    log_1mp = jnp.minimum(-v, 0.0) - log1pev       # log(1 - sigmoid(v)), finite
    pos = (gt == 1.0).astype(f32)
    neg = (gt < 1.0).astype(f32)
    omg = 1.0 - gt
    omg2 = omg * omg
    neg_w = omg2 * omg2                            # (1-gt)^4 via two squares
    omp = 1.0 - pred
    pos_s = jnp.sum(log_p * omp * omp * pos)
    neg_s = jnp.sum(log_1mp * pred * pred * neg_w * neg)
    num_pos = jnp.sum(pos)
    safe_den = jnp.where(num_pos > 0.0, num_pos, 1.0)
    out_ref[2] = jnp.where(num_pos > 0.0, -(pos_s + neg_s) / safe_den, -neg_s)

    # ---- box losses: boxes are (16, MAX_N) with N on the lane axis ----------
    bxs = box_ref[...].astype(f32)
    valid = valid_ref[...].astype(f32)             # (1, MAX_N)
    src_sub = bxs[0:4, :]
    src_obj = bxs[4:8, :]
    tgt_sub = bxs[8:12, :]
    tgt_obj = bxs[12:16, :]
    exist = ((jnp.max(jnp.abs(tgt_obj), axis=0, keepdims=True) > 0.0)
             .astype(f32) * valid)                 # (target_obj != 0).any(dim)

    out_ref[3] = jnp.sum(jnp.abs(src_sub - tgt_sub) * valid)
    out_ref[4] = jnp.sum(jnp.abs(src_obj - tgt_obj) * exist)
    out_ref[5] = jnp.sum(exist)

    def to_xyxy(bb):
        cx, cy, w, h = bb[0:1, :], bb[1:2, :], bb[2:3, :], bb[3:4, :]
        return cx - 0.5 * w, cy - 0.5 * h, cx + 0.5 * w, cy + 0.5 * h

    def paired_giou(a, bb):
        ax1, ay1, ax2, ay2 = to_xyxy(a)
        bx1, by1, bx2, by2 = to_xyxy(bb)
        area_a = (ax2 - ax1) * (ay2 - ay1)
        area_b = (bx2 - bx1) * (by2 - by1)
        iw = jnp.maximum(jnp.minimum(ax2, bx2) - jnp.maximum(ax1, bx1), 0.0)
        ih = jnp.maximum(jnp.minimum(ay2, by2) - jnp.maximum(ay1, by1), 0.0)
        inter = iw * ih
        union = area_a + area_b - inter
        iou = inter / union
        cw = jnp.maximum(jnp.maximum(ax2, bx2) - jnp.minimum(ax1, bx1), 0.0)
        ch = jnp.maximum(jnp.maximum(ay2, by2) - jnp.minimum(ay1, by1), 0.0)
        area_c = cw * ch
        return iou - (area_c - union) / area_c     # (1, MAX_N)

    out_ref[6] = jnp.sum((1.0 - paired_giou(src_sub, tgt_sub)) * valid)
    out_ref[7] = jnp.sum((1.0 - paired_giou(src_obj, tgt_obj)) * exist)


def _fused_criterion_call(obj_logits, ox_flat, ot_flat, vx_flat, vt_flat,
                          boxes_t, box_valid, tgt_lens):
    # Grid-less call: arrays in VMEM, tgt_lens in SMEM, 8 scalar results in SMEM.
    return pl.pallas_call(
        _criterion_kernel,
        out_shape=jax.ShapeDtypeStruct((8,), jnp.float32),
        in_specs=[pl.BlockSpec(memory_space=pltpu.MemorySpace.VMEM)] * 7
                 + [pl.BlockSpec(memory_space=pltpu.MemorySpace.SMEM)],
        out_specs=pl.BlockSpec(memory_space=pltpu.MemorySpace.SMEM),
    )(obj_logits, ox_flat, ot_flat, vx_flat, vt_flat, boxes_t, box_valid,
      tgt_lens)


# ---------------------------------------------------------------------------
# Matcher (glue)
# ---------------------------------------------------------------------------
def identity_matcher(outputs, targets):
    # TODO(synk): Hungarian matching (scipy linear_sum_assignment) has no clean
    # Pallas/TPU equivalent; deterministic identity assignment instead.
    return [(jnp.arange(int(t['obj_labels'].shape[0]), dtype=jnp.int32),
             jnp.arange(int(t['obj_labels'].shape[0]), dtype=jnp.int32))
            for t in targets]


# ---------------------------------------------------------------------------
# Criterion
# ---------------------------------------------------------------------------
class SetCriterionHOI:
    def __init__(self, num_obj_classes, num_queries, num_verb_classes, matcher,
                 weight_dict, eos_coef, losses, focal_alpha=0.25):
        self.num_obj_classes = num_obj_classes
        self.num_queries = num_queries
        self.num_verb_classes = num_verb_classes
        self.matcher = matcher
        self.weight_dict = weight_dict
        self.eos_coef = eos_coef
        self.losses = losses
        self.focal_alpha = focal_alpha

    @staticmethod
    def _get_src_permutation_idx(indices):
        batch_idx = jnp.concatenate(
            [jnp.full_like(src, i) for i, (src, _) in enumerate(indices)])
        src_idx = jnp.concatenate([src for src, _ in indices])
        return batch_idx, src_idx

    def __call__(self, outputs, targets):
        outputs_without_aux = {k: v for k, v in outputs.items()
                               if k not in ('aux_outputs', 'enc_outputs')}
        indices = self.matcher(outputs_without_aux, targets)

        # TODO(synk): distributed all_reduce / world-size clamp omitted.
        num_interactions = sum(int(t['obj_labels'].shape[0]) for t in targets)
        num_interactions = float(max(num_interactions, 1))

        obj_logits = outputs['pred_obj_logits']        # (B, Q, C_obj), model dtype
        verb_logits = outputs['pred_verb_logits']      # (B, Q, C_verb)
        B, Q, C = obj_logits.shape
        V = verb_logits.shape[-1]

        batch_idx, src_idx = self._get_src_permutation_idx(indices)
        target_classes_o = jnp.concatenate(
            [t['obj_labels'][J] for t, (_, J) in zip(targets, indices)])

        # Dense targets in bf16 (exact for {0,1}; halves target DMA bytes).
        target_classes = jnp.full((B, Q), self.num_obj_classes, dtype=jnp.int32)
        target_classes = target_classes.at[batch_idx, src_idx].set(target_classes_o)
        target_onehot = jax.nn.one_hot(target_classes, C, dtype=jnp.bfloat16)

        verb_o = jnp.concatenate(
            [t['verb_labels'][J] for t, (_, J) in zip(targets, indices)], axis=0)
        verb_tgt = jnp.zeros((B, Q, V), jnp.bfloat16)
        verb_tgt = verb_tgt.at[batch_idx, src_idx].set(verb_o.astype(jnp.bfloat16))

        # Lane-dense slabs (logits kept in their native dtype; cast in-kernel).
        ox_flat = _lane_dense(obj_logits, _PAD_LOGIT)
        ot_flat = _lane_dense(target_onehot, 0.0)
        vx_flat = _lane_dense(verb_logits, _PAD_LOGIT)
        vt_flat = _lane_dense(verb_tgt, 0.0)

        tgt_lens = jnp.asarray([float(t['obj_labels'].shape[0]) for t in targets],
                               dtype=jnp.float32)                       # (B,) SMEM

        # Matched boxes, transposed to (4, N) so N sits on the lane axis, padded
        # with a safe unit box (0.5,0.5,0.5,0.5) and masked by `box_valid`.
        src_sub = outputs['pred_sub_boxes'][batch_idx, src_idx]
        src_obj = outputs['pred_obj_boxes'][batch_idx, src_idx]
        tgt_sub = jnp.concatenate(
            [t['sub_boxes'][i] for t, (_, i) in zip(targets, indices)], axis=0)
        tgt_obj = jnp.concatenate(
            [t['obj_boxes'][i] for t, (_, i) in zip(targets, indices)], axis=0)
        n_match = int(src_sub.shape[0])
        max_n = max(8, ((n_match + 7) // 8) * 8)
        n_pad = max_n - n_match

        def _prep(bxy):
            bt = jnp.transpose(bxy.astype(jnp.float32))            # (4, N)
            return jnp.pad(bt, ((0, 0), (0, n_pad)), constant_values=0.5)

        boxes_t = jnp.concatenate(
            [_prep(src_sub), _prep(src_obj), _prep(tgt_sub), _prep(tgt_obj)],
            axis=0)                                                 # (16, MAX_N)
        box_valid = jnp.concatenate(
            [jnp.ones((1, n_match), jnp.float32),
             jnp.zeros((1, n_pad), jnp.float32)], axis=1)           # (1, MAX_N)

        res = _fused_criterion_call(obj_logits, ox_flat, ot_flat, vx_flat,
                                    vt_flat, boxes_t, box_valid, tgt_lens)

        losses = {}
        # sigmoid_focal_loss(...).mean(1).sum()/num_boxes * Q  ==  sum/num_boxes
        losses['loss_obj_ce'] = res[0] / num_interactions

        # obj_class_error: tiny gather/argmax metric over matched queries (JAX).
        matched_logits = obj_logits[batch_idx, src_idx]
        acc = jnp.mean((jnp.argmax(matched_logits, axis=-1)
                        == target_classes_o).astype(jnp.float32)) * 100.0
        losses['obj_class_error'] = 100.0 - acc

        losses['obj_cardinality_error'] = res[1]
        losses['loss_verb_ce'] = res[2]
        losses['loss_sub_bbox'] = res[3] / num_interactions
        losses['loss_obj_bbox'] = res[4] / (res[5] + 0.0001)
        losses['loss_sub_giou'] = res[6] / num_interactions
        losses['loss_obj_giou'] = res[7] / (res[5] + 0.0001)
        # (The n_match == 0 branch of the reference yields the same zeros here,
        #  because every padded box entry is masked out by `box_valid`.)
        return losses


# ---------------------------------------------------------------------------
# Demo
# ---------------------------------------------------------------------------
if __name__ == "__main__":
    key = jax.random.PRNGKey(0)
    B, Q, C_OBJ, C_VERB = 2, 16, 8, 16
    n_tgt = [3, 3]

    ks = jax.random.split(key, 6)
    outputs = {
        'pred_obj_logits': jax.random.normal(ks[0], (B, Q, C_OBJ), jnp.float32),
        'pred_verb_logits': jax.random.normal(ks[1], (B, Q, C_VERB), jnp.float32),
        'pred_sub_boxes': jax.nn.sigmoid(
            jax.random.normal(ks[2], (B, Q, 4), jnp.float32)),
        'pred_obj_boxes': jax.nn.sigmoid(
            jax.random.normal(ks[3], (B, Q, 4), jnp.float32)),
    }

    targets = []
    for b in range(B):
        kb = jax.random.fold_in(ks[4], b)
        k1, k2, k3, k4 = jax.random.split(kb, 4)
        obj_labels = jax.random.randint(k1, (n_tgt[b],), 0, C_OBJ, dtype=jnp.int32)
        verb_labels = (jax.random.uniform(k2, (n_tgt[b], C_VERB)) > 0.7
                       ).astype(jnp.float32)
        sub_boxes = jax.random.uniform(k3, (n_tgt[b], 4), jnp.float32, 0.1, 0.9)
        obj_boxes = jax.random.uniform(k4, (n_tgt[b], 4), jnp.float32, 0.1, 0.9)
        if b == 1:
            obj_boxes = obj_boxes.at[0].set(0.0)   # exercise exist_obj_boxes mask
        targets.append({'obj_labels': obj_labels, 'verb_labels': verb_labels,
                        'sub_boxes': sub_boxes, 'obj_boxes': obj_boxes})

    criterion = SetCriterionHOI(
        num_obj_classes=C_OBJ, num_queries=Q, num_verb_classes=C_VERB,
        matcher=identity_matcher,
        weight_dict={'loss_obj_ce': 1.0, 'loss_verb_ce': 1.0,
                     'loss_sub_bbox': 2.5, 'loss_obj_bbox': 2.5,
                     'loss_sub_giou': 1.0, 'loss_obj_giou': 1.0},
        eos_coef=0.1,
        losses=['obj_labels', 'obj_cardinality', 'verb_labels', 'sub_obj_boxes'],
        focal_alpha=0.25)

    losses = criterion(outputs, targets)
    jax.block_until_ready(jax.tree_util.tree_leaves(losses))
    print("KERNEL_OK")
</pallas_src>

<mosaic_0001>
module attributes {stable_mosaic.version = 11 : i64} {
  func.func @_criterion_kernel(%arg0: memref<2x16x8xf32, #tpu.memory_space<vmem>>, %arg1: memref<2x128xf32, #tpu.memory_space<vmem>>, %arg2: memref<2x128xbf16, #tpu.memory_space<vmem>>, %arg3: memref<4x128xf32, #tpu.memory_space<vmem>>, %arg4: memref<4x128xbf16, #tpu.memory_space<vmem>>, %arg5: memref<16x8xf32, #tpu.memory_space<vmem>>, %arg6: memref<1x8xf32, #tpu.memory_space<vmem>>, %arg7: memref<2xf32, #tpu.memory_space<smem>>, %arg8: memref<8xf32, #tpu.memory_space<smem>>) attributes {dimension_semantics = [], scalar_prefetch = 0 : i64, scratch_operands = 0 : i64, tpu.core_type = #tpu.core_type<tc>} {
    %c0 = arith.constant 0 : index
    %c0_0 = arith.constant 0 : index
    %0 = vector.load %arg1[%c0, %c0_0] : memref<2x128xf32, #tpu.memory_space<vmem>>, vector<2x128xf32>
    %c0_1 = arith.constant 0 : index
    %c0_2 = arith.constant 0 : index
    %1 = vector.load %arg2[%c0_1, %c0_2] : memref<2x128xbf16, #tpu.memory_space<vmem>>, vector<2x128xbf16>
    %2 = arith.extf %1 : vector<2x128xbf16> to vector<2x128xf32>
    %3 = math.absf %0 : vector<2x128xf32>
    %cst = arith.constant 0.000000e+00 : f32
    %4 = vector.broadcast %cst : f32 to vector<2x128xf32>
    %5 = arith.subf %4, %3 : vector<2x128xf32>
    %6 = math.exp %5 : vector<2x128xf32>
    %7 = math.log1p %6 : vector<2x128xf32>
    %cst_3 = arith.constant 0.000000e+00 : f32
    %8 = vector.broadcast %cst_3 : f32 to vector<2x128xf32>
    %9 = arith.maximumf %0, %8 : vector<2x128xf32>
    %10 = arith.mulf %0, %2 : vector<2x128xf32>
    %11 = arith.subf %9, %10 : vector<2x128xf32>
    %12 = arith.addf %11, %7 : vector<2x128xf32>
    %cst_4 = arith.constant 1.000000e+00 : f32
    %13 = vector.broadcast %cst_4 : f32 to vector<2x128xf32>
    %14 = arith.addf %13, %6 : vector<2x128xf32>
    %15 = tpu.reciprocal %14 {approx = true} : vector<2x128xf32> -> vector<2x128xf32>
    %cst_5 = arith.constant 0.000000e+00 : f32
    %16 = vector.broadcast %cst_5 : f32 to vector<2x128xf32>
    %17 = arith.cmpf oge, %0, %16 : vector<2x128xf32>
    %18 = arith.mulf %6, %15 : vector<2x128xf32>
    %19 = arith.select %17, %15, %18 : vector<2x128xi1>, vector<2x128xf32>
    %20 = arith.mulf %19, %2 : vector<2x128xf32>
    %cst_6 = arith.constant 1.000000e+00 : f32
    %21 = vector.broadcast %cst_6 : f32 to vector<2x128xf32>
    %22 = arith.subf %21, %19 : vector<2x128xf32>
    %cst_7 = arith.constant 1.000000e+00 : f32
    %23 = vector.broadcast %cst_7 : f32 to vector<2x128xf32>
    %24 = arith.subf %23, %2 : vector<2x128xf32>
    %25 = arith.mulf %22, %24 : vector<2x128xf32>
    %26 = arith.addf %20, %25 : vector<2x128xf32>
    %cst_8 = arith.constant 1.000000e+00 : f32
    %27 = vector.broadcast %cst_8 : f32 to vector<2x128xf32>
    %28 = arith.subf %27, %26 : vector<2x128xf32>
    %cst_9 = arith.constant 2.500000e-01 : f32
    %29 = vector.broadcast %cst_9 : f32 to vector<2x128xf32>
    %30 = arith.mulf %29, %2 : vector<2x128xf32>
    %cst_10 = arith.constant 1.000000e+00 : f32
    %31 = vector.broadcast %cst_10 : f32 to vector<2x128xf32>
    %32 = arith.subf %31, %2 : vector<2x128xf32>
    %cst_11 = arith.constant 7.500000e-01 : f32
    %33 = vector.broadcast %cst_11 : f32 to vector<2x128xf32>
    %34 = arith.mulf %33, %32 : vector<2x128xf32>
    %35 = arith.addf %30, %34 : vector<2x128xf32>
    %36 = arith.mulf %35, %12 : vector<2x128xf32>
    %37 = arith.mulf %36, %28 : vector<2x128xf32>
    %38 = arith.mulf %37, %28 : vector<2x128xf32>
    %39 = vector.shape_cast %38 : vector<2x128xf32> to vector<1x2x128xf32>
    %cst_12 = arith.constant dense<0.000000e+00> : vector<1xf32>
    %40 = vector.multi_reduction <add>, %39, %cst_12 [1, 2] : vector<1x2x128xf32> to vector<1xf32>
    %41 = vector.shape_cast %40 : vector<1xf32> to vector<1x1x1xf32>
    %42 = vector.extract %41[0, 0, 0] : f32 from vector<1x1x1xf32>
    %c0_13 = arith.constant 0 : index
    %43 = memref.load %arg8[%c0_13] : memref<8xf32, #tpu.memory_space<smem>>
    memref.store %42, %arg8[%c0_13] : memref<8xf32, #tpu.memory_space<smem>>
    %c0_14 = arith.constant 0 : index
    %c0_15 = arith.constant 0 : index
    %c0_16 = arith.constant 0 : index
    %44 = vector.load %arg0[%c0_14, %c0_15, %c0_16] : memref<2x16x8xf32, #tpu.memory_space<vmem>>, vector<2x16x8xf32>
    %45 = vector.extract_strided_slice %44 {offsets = [0, 0, 7], sizes = [2, 16, 1], strides = [1, 1, 1]} : vector<2x16x8xf32> to vector<2x16x1xf32>
    %46 = vector.extract_strided_slice %44 {offsets = [0, 0, 0], sizes = [2, 16, 7], strides = [1, 1, 1]} : vector<2x16x8xf32> to vector<2x16x7xf32>
    %cst_17 = arith.constant dense<0xFF800000> : vector<2x16xf32>
    %47 = vector.multi_reduction <maximumf>, %46, %cst_17 [2] : vector<2x16x7xf32> to vector<2x16xf32>
    %48 = vector.shape_cast %47 : vector<2x16xf32> to vector<2x16x1xf32>
    %49 = arith.cmpf oge, %48, %45 : vector<2x16x1xf32>
    %50 = arith.extui %49 : vector<2x16x1xi1> to vector<2x16x1xi32>
    %51 = arith.sitofp %50 : vector<2x16x1xi32> to vector<2x16x1xf32>
    %52 = vector.extract_strided_slice %51 {offsets = [0, 0, 0], sizes = [1, 16, 1], strides = [1, 1, 1]} : vector<2x16x1xf32> to vector<1x16x1xf32>
    %53 = vector.shape_cast %52 : vector<1x16x1xf32> to vector<1x1x16x1xf32>
    %cst_18 = arith.constant dense<0.000000e+00> : vector<1xf32>
    %54 = vector.multi_reduction <add>, %53, %cst_18 [1, 2, 3] : vector<1x1x16x1xf32> to vector<1xf32>
    %55 = vector.shape_cast %54 : vector<1xf32> to vector<1x1x1x1xf32>
    %56 = vector.extract %55[0, 0, 0, 0] : f32 from vector<1x1x1x1xf32>
    %c0_19 = arith.constant 0 : index
    %57 = memref.load %arg7[%c0_19] : memref<2xf32, #tpu.memory_space<smem>>
    %58 = arith.subf %56, %57 : f32
    %59 = math.absf %58 : f32
    %cst_20 = arith.constant 0.000000e+00 : f32
    %60 = arith.addf %cst_20, %59 : f32
    %61 = vector.extract_strided_slice %51 {offsets = [1, 0, 0], sizes = [1, 16, 1], strides = [1, 1, 1]} : vector<2x16x1xf32> to vector<1x16x1xf32>
    %62 = vector.shape_cast %61 : vector<1x16x1xf32> to vector<1x1x16x1xf32>
    %cst_21 = arith.constant dense<0.000000e+00> : vector<1xf32>
    %63 = vector.multi_reduction <add>, %62, %cst_21 [1, 2, 3] : vector<1x1x16x1xf32> to vector<1xf32>
    %64 = vector.shape_cast %63 : vector<1xf32> to vector<1x1x1x1xf32>
    %65 = vector.extract %64[0, 0, 0, 0] : f32 from vector<1x1x1x1xf32>
    %c1 = arith.constant 1 : index
    %66 = memref.load %arg7[%c1] : memref<2xf32, #tpu.memory_space<smem>>
    %67 = arith.subf %65, %66 : f32
    %68 = math.absf %67 : f32
    %69 = arith.addf %60, %68 : f32
    %cst_22 = arith.constant 2.000000e+00 : f32
    %70 = arith.divf %69, %cst_22 : f32
    %c1_23 = arith.constant 1 : index
    %71 = memref.load %arg8[%c1_23] : memref<8xf32, #tpu.memory_space<smem>>
    memref.store %70, %arg8[%c1_23] : memref<8xf32, #tpu.memory_space<smem>>
    %c0_24 = arith.constant 0 : index
    %c0_25 = arith.constant 0 : index
    %72 = vector.load %arg3[%c0_24, %c0_25] : memref<4x128xf32, #tpu.memory_space<vmem>>, vector<4x128xf32>
    %c0_26 = arith.constant 0 : index
    %c0_27 = arith.constant 0 : index
    %73 = vector.load %arg4[%c0_26, %c0_27] : memref<4x128xbf16, #tpu.memory_space<vmem>>, vector<4x128xbf16>
    %74 = arith.extf %73 : vector<4x128xbf16> to vector<4x128xf32>
    %75 = math.absf %72 : vector<4x128xf32>
    %cst_28 = arith.constant 0.000000e+00 : f32
    %76 = vector.broadcast %cst_28 : f32 to vector<4x128xf32>
    %77 = arith.subf %76, %75 : vector<4x128xf32>
    %78 = math.exp %77 : vector<4x128xf32>
    %79 = math.log1p %78 : vector<4x128xf32>
    %cst_29 = arith.constant 1.000000e+00 : f32
    %80 = vector.broadcast %cst_29 : f32 to vector<4x128xf32>
    %81 = arith.addf %80, %78 : vector<4x128xf32>
    %82 = tpu.reciprocal %81 {approx = true} : vector<4x128xf32> -> vector<4x128xf32>
    %cst_30 = arith.constant 0.000000e+00 : f32
    %83 = vector.broadcast %cst_30 : f32 to vector<4x128xf32>
    %84 = arith.cmpf oge, %72, %83 : vector<4x128xf32>
    %85 = arith.mulf %78, %82 : vector<4x128xf32>
    %86 = arith.select %84, %82, %85 : vector<4x128xi1>, vector<4x128xf32>
    %cst_31 = arith.constant 0.000000e+00 : f32
    %87 = vector.broadcast %cst_31 : f32 to vector<4x128xf32>
    %88 = arith.minimumf %72, %87 : vector<4x128xf32>
    %89 = arith.subf %88, %79 : vector<4x128xf32>
    %cst_32 = arith.constant 0.000000e+00 : f32
    %90 = vector.broadcast %cst_32 : f32 to vector<4x128xf32>
    %91 = arith.subf %90, %72 : vector<4x128xf32>
    %cst_33 = arith.constant 0.000000e+00 : f32
    %92 = vector.broadcast %cst_33 : f32 to vector<4x128xf32>
    %93 = arith.minimumf %91, %92 : vector<4x128xf32>
    %94 = arith.subf %93, %79 : vector<4x128xf32>
    %cst_34 = arith.constant 1.000000e+00 : f32
    %95 = vector.broadcast %cst_34 : f32 to vector<4x128xf32>
    %96 = arith.cmpf oeq, %74, %95 : vector<4x128xf32>
    %97 = arith.extui %96 : vector<4x128xi1> to vector<4x128xi32>
    %98 = arith.sitofp %97 : vector<4x128xi32> to vector<4x128xf32>
    %cst_35 = arith.constant 1.000000e+00 : f32
    %99 = vector.broadcast %cst_35 : f32 to vector<4x128xf32>
    %100 = arith.cmpf olt, %74, %99 : vector<4x128xf32>
    %101 = arith.extui %100 : vector<4x128xi1> to vector<4x128xi32>
    %102 = arith.sitofp %101 : vector<4x128xi32> to vector<4x128xf32>
    %cst_36 = arith.constant 1.000000e+00 : f32
    %103 = vector.broadcast %cst_36 : f32 to vector<4x128xf32>
    %104 = arith.subf %103, %74 : vector<4x128xf32>
    %105 = arith.mulf %104, %104 : vector<4x128xf32>
    %106 = arith.mulf %105, %105 : vector<4x128xf32>
    %cst_37 = arith.constant 1.000000e+00 : f32
    %107 = vector.broadcast %cst_37 : f32 to vector<4x128xf32>
    %108 = arith.subf %107, %86 : vector<4x128xf32>
    %109 = arith.mulf %89, %108 : vector<4x128xf32>
    %110 = arith.mulf %109, %108 : vector<4x128xf32>
    %111 = arith.mulf %110, %98 : vector<4x128xf32>
    %112 = vector.shape_cast %111 : vector<4x128xf32> to vector<1x4x128xf32>
    %cst_38 = arith.constant dense<0.000000e+00> : vector<1xf32>
    %113 = vector.multi_reduction <add>, %112, %cst_38 [1, 2] : vector<1x4x128xf32> to vector<1xf32>
    %114 = vector.shape_cast %113 : vector<1xf32> to vector<1x1x1xf32>
    %115 = vector.extract %114[0, 0, 0] : f32 from vector<1x1x1xf32>
    %116 = arith.mulf %94, %86 : vector<4x128xf32>
    %117 = arith.mulf %116, %86 : vector<4x128xf32>
    %118 = arith.mulf %117, %106 : vector<4x128xf32>
    %119 = arith.mulf %118, %102 : vector<4x128xf32>
    %120 = vector.shape_cast %119 : vector<4x128xf32> to vector<1x4x128xf32>
    %cst_39 = arith.constant dense<0.000000e+00> : vector<1xf32>
    %121 = vector.multi_reduction <add>, %120, %cst_39 [1, 2] : vector<1x4x128xf32> to vector<1xf32>
    %122 = vector.shape_cast %121 : vector<1xf32> to vector<1x1x1xf32>
    %123 = vector.extract %122[0, 0, 0] : f32 from vector<1x1x1xf32>
    %124 = vector.shape_cast %98 : vector<4x128xf32> to vector<1x4x128xf32>
    %cst_40 = arith.constant dense<0.000000e+00> : vector<1xf32>
    %125 = vector.multi_reduction <add>, %124, %cst_40 [1, 2] : vector<1x4x128xf32> to vector<1xf32>
    %126 = vector.shape_cast %125 : vector<1xf32> to vector<1x1x1xf32>
    %127 = vector.extract %126[0, 0, 0] : f32 from vector<1x1x1xf32>
    %cst_41 = arith.constant 0.000000e+00 : f32
    %128 = arith.cmpf ogt, %127, %cst_41 : f32
    %cst_42 = arith.constant 1.000000e+00 : f32
    %129 = arith.select %128, %127, %cst_42 : f32
    %cst_43 = arith.constant 0.000000e+00 : f32
    %130 = arith.cmpf ogt, %127, %cst_43 : f32
    %131 = arith.addf %115, %123 : f32
    %cst_44 = arith.constant 0.000000e+00 : f32
    %132 = arith.subf %cst_44, %131 : f32
    %133 = arith.divf %132, %129 : f32
    %cst_45 = arith.constant 0.000000e+00 : f32
    %134 = arith.subf %cst_45, %123 : f32
    %135 = arith.select %130, %133, %134 : f32
    %c2 = arith.constant 2 : index
    %136 = memref.load %arg8[%c2] : memref<8xf32, #tpu.memory_space<smem>>
    memref.store %135, %arg8[%c2] : memref<8xf32, #tpu.memory_space<smem>>
    %c0_46 = arith.constant 0 : index
    %c0_47 = arith.constant 0 : index
    %137 = vector.load %arg5[%c0_46, %c0_47] : memref<16x8xf32, #tpu.memory_space<vmem>>, vector<16x8xf32>
    %c0_48 = arith.constant 0 : index
    %c0_49 = arith.constant 0 : index
    %138 = vector.load %arg6[%c0_48, %c0_49] : memref<1x8xf32, #tpu.memory_space<vmem>>, vector<1x8xf32>
    %139 = vector.extract_strided_slice %137 {offsets = [0, 0], sizes = [4, 8], strides = [1, 1]} : vector<16x8xf32> to vector<4x8xf32>
    %140 = vector.extract_strided_slice %137 {offsets = [4, 0], sizes = [4, 8], strides = [1, 1]} : vector<16x8xf32> to vector<4x8xf32>
    %141 = vector.extract_strided_slice %137 {offsets = [8, 0], sizes = [4, 8], strides = [1, 1]} : vector<16x8xf32> to vector<4x8xf32>
    %142 = vector.extract_strided_slice %137 {offsets = [12, 0], sizes = [4, 8], strides = [1, 1]} : vector<16x8xf32> to vector<4x8xf32>
    %143 = math.absf %142 : vector<4x8xf32>
    %cst_50 = arith.constant dense<0xFF800000> : vector<8xf32>
    %144 = vector.multi_reduction <maximumf>, %143, %cst_50 [0] : vector<4x8xf32> to vector<8xf32>
    %145 = vector.shape_cast %144 : vector<8xf32> to vector<1x8xf32>
    %cst_51 = arith.constant 0.000000e+00 : f32
    %146 = vector.broadcast %cst_51 : f32 to vector<1x8xf32>
    %147 = arith.cmpf ogt, %145, %146 : vector<1x8xf32>
    %148 = arith.extui %147 : vector<1x8xi1> to vector<1x8xi32>
    %149 = arith.sitofp %148 : vector<1x8xi32> to vector<1x8xf32>
    %150 = arith.mulf %149, %138 : vector<1x8xf32>
    %151 = arith.subf %139, %141 : vector<4x8xf32>
    %152 = math.absf %151 : vector<4x8xf32>
    %153 = vector.broadcast %138 : vector<1x8xf32> to vector<4x8xf32>
    %154 = arith.mulf %152, %153 : vector<4x8xf32>
    %155 = vector.shape_cast %154 : vector<4x8xf32> to vector<1x4x8xf32>
    %cst_52 = arith.constant dense<0.000000e+00> : vector<1xf32>
    %156 = vector.multi_reduction <add>, %155, %cst_52 [1, 2] : vector<1x4x8xf32> to vector<1xf32>
    %157 = vector.shape_cast %156 : vector<1xf32> to vector<1x1x1xf32>
    %158 = vector.extract %157[0, 0, 0] : f32 from vector<1x1x1xf32>
    %c3 = arith.constant 3 : index
    %159 = memref.load %arg8[%c3] : memref<8xf32, #tpu.memory_space<smem>>
    memref.store %158, %arg8[%c3] : memref<8xf32, #tpu.memory_space<smem>>
    %160 = arith.subf %140, %142 : vector<4x8xf32>
    %161 = math.absf %160 : vector<4x8xf32>
    %162 = vector.broadcast %150 : vector<1x8xf32> to vector<4x8xf32>
    %163 = arith.mulf %161, %162 : vector<4x8xf32>
    %164 = vector.shape_cast %163 : vector<4x8xf32> to vector<1x4x8xf32>
    %cst_53 = arith.constant dense<0.000000e+00> : vector<1xf32>
    %165 = vector.multi_reduction <add>, %164, %cst_53 [1, 2] : vector<1x4x8xf32> to vector<1xf32>
    %166 = vector.shape_cast %165 : vector<1xf32> to vector<1x1x1xf32>
    %167 = vector.extract %166[0, 0, 0] : f32 from vector<1x1x1xf32>
    %c4 = arith.constant 4 : index
    %168 = memref.load %arg8[%c4] : memref<8xf32, #tpu.memory_space<smem>>
    memref.store %167, %arg8[%c4] : memref<8xf32, #tpu.memory_space<smem>>
    %169 = vector.shape_cast %150 : vector<1x8xf32> to vector<1x1x8xf32>
    %cst_54 = arith.constant dense<0.000000e+00> : vector<1xf32>
    %170 = vector.multi_reduction <add>, %169, %cst_54 [1, 2] : vector<1x1x8xf32> to vector<1xf32>
    %171 = vector.shape_cast %170 : vector<1xf32> to vector<1x1x1xf32>
    %172 = vector.extract %171[0, 0, 0] : f32 from vector<1x1x1xf32>
    %c5 = arith.constant 5 : index
    %173 = memref.load %arg8[%c5] : memref<8xf32, #tpu.memory_space<smem>>
    memref.store %172, %arg8[%c5] : memref<8xf32, #tpu.memory_space<smem>>
    %174 = vector.extract_strided_slice %139 {offsets = [0, 0], sizes = [1, 8], strides = [1, 1]} : vector<4x8xf32> to vector<1x8xf32>
    %175 = vector.extract_strided_slice %139 {offsets = [1, 0], sizes = [1, 8], strides = [1, 1]} : vector<4x8xf32> to vector<1x8xf32>
    %176 = vector.extract_strided_slice %139 {offsets = [2, 0], sizes = [1, 8], strides = [1, 1]} : vector<4x8xf32> to vector<1x8xf32>
    %177 = vector.extract_strided_slice %139 {offsets = [3, 0], sizes = [1, 8], strides = [1, 1]} : vector<4x8xf32> to vector<1x8xf32>
    %cst_55 = arith.constant 5.000000e-01 : f32
    %178 = vector.broadcast %cst_55 : f32 to vector<1x8xf32>
    %179 = arith.mulf %178, %176 : vector<1x8xf32>
    %180 = arith.subf %174, %179 : vector<1x8xf32>
    %cst_56 = arith.constant 5.000000e-01 : f32
    %181 = vector.broadcast %cst_56 : f32 to vector<1x8xf32>
    %182 = arith.mulf %181, %177 : vector<1x8xf32>
    %183 = arith.subf %175, %182 : vector<1x8xf32>
    %cst_57 = arith.constant 5.000000e-01 : f32
    %184 = vector.broadcast %cst_57 : f32 to vector<1x8xf32>
    %185 = arith.mulf %184, %176 : vector<1x8xf32>
    %186 = arith.addf %174, %185 : vector<1x8xf32>
    %cst_58 = arith.constant 5.000000e-01 : f32
    %187 = vector.broadcast %cst_58 : f32 to vector<1x8xf32>
    %188 = arith.mulf %187, %177 : vector<1x8xf32>
    %189 = arith.addf %175, %188 : vector<1x8xf32>
    %190 = vector.extract_strided_slice %141 {offsets = [0, 0], sizes = [1, 8], strides = [1, 1]} : vector<4x8xf32> to vector<1x8xf32>
    %191 = vector.extract_strided_slice %141 {offsets = [1, 0], sizes = [1, 8], strides = [1, 1]} : vector<4x8xf32> to vector<1x8xf32>
    %192 = vector.extract_strided_slice %141 {offsets = [2, 0], sizes = [1, 8], strides = [1, 1]} : vector<4x8xf32> to vector<1x8xf32>
    %193 = vector.extract_strided_slice %141 {offsets = [3, 0], sizes = [1, 8], strides = [1, 1]} : vector<4x8xf32> to vector<1x8xf32>
    %cst_59 = arith.constant 5.000000e-01 : f32
    %194 = vector.broadcast %cst_59 : f32 to vector<1x8xf32>
    %195 = arith.mulf %194, %192 : vector<1x8xf32>
    %196 = arith.subf %190, %195 : vector<1x8xf32>
    %cst_60 = arith.constant 5.000000e-01 : f32
    %197 = vector.broadcast %cst_60 : f32 to vector<1x8xf32>
    %198 = arith.mulf %197, %193 : vector<1x8xf32>
    %199 = arith.subf %191, %198 : vector<1x8xf32>
    %cst_61 = arith.constant 5.000000e-01 : f32
    %200 = vector.broadcast %cst_61 : f32 to vector<1x8xf32>
    %201 = arith.mulf %200, %192 : vector<1x8xf32>
    %202 = arith.addf %190, %201 : vector<1x8xf32>
    %cst_62 = arith.constant 5.000000e-01 : f32
    %203 = vector.broadcast %cst_62 : f32 to vector<1x8xf32>
    %204 = arith.mulf %203, %193 : vector<1x8xf32>
    %205 = arith.addf %191, %204 : vector<1x8xf32>
    %206 = arith.subf %186, %180 : vector<1x8xf32>
    %207 = arith.subf %189, %183 : vector<1x8xf32>
    %208 = arith.mulf %206, %207 : vector<1x8xf32>
    %209 = arith.subf %202, %196 : vector<1x8xf32>
    %210 = arith.subf %205, %199 : vector<1x8xf32>
    %211 = arith.mulf %209, %210 : vector<1x8xf32>
    %212 = arith.minimumf %186, %202 : vector<1x8xf32>
    %213 = arith.maximumf %180, %196 : vector<1x8xf32>
    %214 = arith.subf %212, %213 : vector<1x8xf32>
    %cst_63 = arith.constant 0.000000e+00 : f32
    %215 = vector.broadcast %cst_63 : f32 to vector<1x8xf32>
    %216 = arith.maximumf %214, %215 : vector<1x8xf32>
    %217 = arith.minimumf %189, %205 : vector<1x8xf32>
    %218 = arith.maximumf %183, %199 : vector<1x8xf32>
    %219 = arith.subf %217, %218 : vector<1x8xf32>
    %cst_64 = arith.constant 0.000000e+00 : f32
    %220 = vector.broadcast %cst_64 : f32 to vector<1x8xf32>
    %221 = arith.maximumf %219, %220 : vector<1x8xf32>
    %222 = arith.mulf %216, %221 : vector<1x8xf32>
    %223 = arith.addf %208, %211 : vector<1x8xf32>
    %224 = arith.subf %223, %222 : vector<1x8xf32>
    %225 = arith.divf %222, %224 : vector<1x8xf32>
    %226 = arith.maximumf %186, %202 : vector<1x8xf32>
    %227 = arith.minimumf %180, %196 : vector<1x8xf32>
    %228 = arith.subf %226, %227 : vector<1x8xf32>
    %cst_65 = arith.constant 0.000000e+00 : f32
    %229 = vector.broadcast %cst_65 : f32 to vector<1x8xf32>
    %230 = arith.maximumf %228, %229 : vector<1x8xf32>
    %231 = arith.maximumf %189, %205 : vector<1x8xf32>
    %232 = arith.minimumf %183, %199 : vector<1x8xf32>
    %233 = arith.subf %231, %232 : vector<1x8xf32>
    %cst_66 = arith.constant 0.000000e+00 : f32
    %234 = vector.broadcast %cst_66 : f32 to vector<1x8xf32>
    %235 = arith.maximumf %233, %234 : vector<1x8xf32>
    %236 = arith.mulf %230, %235 : vector<1x8xf32>
    %237 = arith.subf %236, %224 : vector<1x8xf32>
    %238 = arith.divf %237, %236 : vector<1x8xf32>
    %239 = arith.subf %225, %238 : vector<1x8xf32>
    %cst_67 = arith.constant 1.000000e+00 : f32
    %240 = vector.broadcast %cst_67 : f32 to vector<1x8xf32>
    %241 = arith.subf %240, %239 : vector<1x8xf32>
    %242 = arith.mulf %241, %138 : vector<1x8xf32>
    %243 = vector.shape_cast %242 : vector<1x8xf32> to vector<1x1x8xf32>
    %cst_68 = arith.constant dense<0.000000e+00> : vector<1xf32>
    %244 = vector.multi_reduction <add>, %243, %cst_68 [1, 2] : vector<1x1x8xf32> to vector<1xf32>
    %245 = vector.shape_cast %244 : vector<1xf32> to vector<1x1x1xf32>
    %246 = vector.extract %245[0, 0, 0] : f32 from vector<1x1x1xf32>
    %c6 = arith.constant 6 : index
    %247 = memref.load %arg8[%c6] : memref<8xf32, #tpu.memory_space<smem>>
    memref.store %246, %arg8[%c6] : memref<8xf32, #tpu.memory_space<smem>>
    %248 = vector.extract_strided_slice %140 {offsets = [0, 0], sizes = [1, 8], strides = [1, 1]} : vector<4x8xf32> to vector<1x8xf32>
    %249 = vector.extract_strided_slice %140 {offsets = [1, 0], sizes = [1, 8], strides = [1, 1]} : vector<4x8xf32> to vector<1x8xf32>
    %250 = vector.extract_strided_slice %140 {offsets = [2, 0], sizes = [1, 8], strides = [1, 1]} : vector<4x8xf32> to vector<1x8xf32>
    %251 = vector.extract_strided_slice %140 {offsets = [3, 0], sizes = [1, 8], strides = [1, 1]} : vector<4x8xf32> to vector<1x8xf32>
    %cst_69 = arith.constant 5.000000e-01 : f32
    %252 = vector.broadcast %cst_69 : f32 to vector<1x8xf32>
    %253 = arith.mulf %252, %250 : vector<1x8xf32>
    %254 = arith.subf %248, %253 : vector<1x8xf32>
    %cst_70 = arith.constant 5.000000e-01 : f32
    %255 = vector.broadcast %cst_70 : f32 to vector<1x8xf32>
    %256 = arith.mulf %255, %251 : vector<1x8xf32>
    %257 = arith.subf %249, %256 : vector<1x8xf32>
    %cst_71 = arith.constant 5.000000e-01 : f32
    %258 = vector.broadcast %cst_71 : f32 to vector<1x8xf32>
    %259 = arith.mulf %258, %250 : vector<1x8xf32>
    %260 = arith.addf %248, %259 : vector<1x8xf32>
    %cst_72 = arith.constant 5.000000e-01 : f32
    %261 = vector.broadcast %cst_72 : f32 to vector<1x8xf32>
    %262 = arith.mulf %261, %251 : vector<1x8xf32>
    %263 = arith.addf %249, %262 : vector<1x8xf32>
    %264 = vector.extract_strided_slice %142 {offsets = [0, 0], sizes = [1, 8], strides = [1, 1]} : vector<4x8xf32> to vector<1x8xf32>
    %265 = vector.extract_strided_slice %142 {offsets = [1, 0], sizes = [1, 8], strides = [1, 1]} : vector<4x8xf32> to vector<1x8xf32>
    %266 = vector.extract_strided_slice %142 {offsets = [2, 0], sizes = [1, 8], strides = [1, 1]} : vector<4x8xf32> to vector<1x8xf32>
    %267 = vector.extract_strided_slice %142 {offsets = [3, 0], sizes = [1, 8], strides = [1, 1]} : vector<4x8xf32> to vector<1x8xf32>
    %cst_73 = arith.constant 5.000000e-01 : f32
    %268 = vector.broadcast %cst_73 : f32 to vector<1x8xf32>
    %269 = arith.mulf %268, %266 : vector<1x8xf32>
    %270 = arith.subf %264, %269 : vector<1x8xf32>
    %cst_74 = arith.constant 5.000000e-01 : f32
    %271 = vector.broadcast %cst_74 : f32 to vector<1x8xf32>
    %272 = arith.mulf %271, %267 : vector<1x8xf32>
    %273 = arith.subf %265, %272 : vector<1x8xf32>
    %cst_75 = arith.constant 5.000000e-01 : f32
    %274 = vector.broadcast %cst_75 : f32 to vector<1x8xf32>
    %275 = arith.mulf %274, %266 : vector<1x8xf32>
    %276 = arith.addf %264, %275 : vector<1x8xf32>
    %cst_76 = arith.constant 5.000000e-01 : f32
    %277 = vector.broadcast %cst_76 : f32 to vector<1x8xf32>
    %278 = arith.mulf %277, %267 : vector<1x8xf32>
    %279 = arith.addf %265, %278 : vector<1x8xf32>
    %280 = arith.subf %260, %254 : vector<1x8xf32>
    %281 = arith.subf %263, %257 : vector<1x8xf32>
    %282 = arith.mulf %280, %281 : vector<1x8xf32>
    %283 = arith.subf %276, %270 : vector<1x8xf32>
    %284 = arith.subf %279, %273 : vector<1x8xf32>
    %285 = arith.mulf %283, %284 : vector<1x8xf32>
    %286 = arith.minimumf %260, %276 : vector<1x8xf32>
    %287 = arith.maximumf %254, %270 : vector<1x8xf32>
    %288 = arith.subf %286, %287 : vector<1x8xf32>
    %cst_77 = arith.constant 0.000000e+00 : f32
    %289 = vector.broadcast %cst_77 : f32 to vector<1x8xf32>
    %290 = arith.maximumf %288, %289 : vector<1x8xf32>
    %291 = arith.minimumf %263, %279 : vector<1x8xf32>
    %292 = arith.maximumf %257, %273 : vector<1x8xf32>
    %293 = arith.subf %291, %292 : vector<1x8xf32>
    %cst_78 = arith.constant 0.000000e+00 : f32
    %294 = vector.broadcast %cst_78 : f32 to vector<1x8xf32>
    %295 = arith.maximumf %293, %294 : vector<1x8xf32>
    %296 = arith.mulf %290, %295 : vector<1x8xf32>
    %297 = arith.addf %282, %285 : vector<1x8xf32>
    %298 = arith.subf %297, %296 : vector<1x8xf32>
    %299 = arith.divf %296, %298 : vector<1x8xf32>
    %300 = arith.maximumf %260, %276 : vector<1x8xf32>
    %301 = arith.minimumf %254, %270 : vector<1x8xf32>
    %302 = arith.subf %300, %301 : vector<1x8xf32>
    %cst_79 = arith.constant 0.000000e+00 : f32
    %303 = vector.broadcast %cst_79 : f32 to vector<1x8xf32>
    %304 = arith.maximumf %302, %303 : vector<1x8xf32>
    %305 = arith.maximumf %263, %279 : vector<1x8xf32>
    %306 = arith.minimumf %257, %273 : vector<1x8xf32>
    %307 = arith.subf %305, %306 : vector<1x8xf32>
    %cst_80 = arith.constant 0.000000e+00 : f32
    %308 = vector.broadcast %cst_80 : f32 to vector<1x8xf32>
    %309 = arith.maximumf %307, %308 : vector<1x8xf32>
    %310 = arith.mulf %304, %309 : vector<1x8xf32>
    %311 = arith.subf %310, %298 : vector<1x8xf32>
    %312 = arith.divf %311, %310 : vector<1x8xf32>
    %313 = arith.subf %299, %312 : vector<1x8xf32>
    %cst_81 = arith.constant 1.000000e+00 : f32
    %314 = vector.broadcast %cst_81 : f32 to vector<1x8xf32>
    %315 = arith.subf %314, %313 : vector<1x8xf32>
    %316 = arith.mulf %315, %150 : vector<1x8xf32>
    %317 = vector.shape_cast %316 : vector<1x8xf32> to vector<1x1x8xf32>
    %cst_82 = arith.constant dense<0.000000e+00> : vector<1xf32>
    %318 = vector.multi_reduction <add>, %317, %cst_82 [1, 2] : vector<1x1x8xf32> to vector<1xf32>
    %319 = vector.shape_cast %318 : vector<1xf32> to vector<1x1x1xf32>
    %320 = vector.extract %319[0, 0, 0] : f32 from vector<1x1x1xf32>
    %c7 = arith.constant 7 : index
    %321 = memref.load %arg8[%c7] : memref<8xf32, #tpu.memory_space<smem>>
    memref.store %320, %arg8[%c7] : memref<8xf32, #tpu.memory_space<smem>>
    return
  }
}

</mosaic_0001>

<bundles_post_ra>
// kernel: tpu_custom_call.1
= control target key start
LH: loop header
LB: loop body
LE: loop exit
PB: predicated region body
PF: predicated region fallthrough
CT: control target
= control target key end

     0   :  { %13 = vsyncpa [#allocation4], 0  ;;  %s736_s0 = inlined_call_operand.vmem [shape: f32[2,16,8], index: 0, kind: input, shape index: {}]   ;;  %s737_s1 = inlined_call_operand.vmem [shape: f32[2,128], index: 1, kind: input, shape index: {}]   ;;  %s738_s2 = inlined_call_operand.vmem [shape: bf16[2,128], index: 2, kind: input, shape index: {}]   ;;  %s739_s3 = inlined_call_operand.vmem [shape: f32[4,128], index: 3, kind: input, shape index: {}]   ;;  %s740_s4 = inlined_call_operand.vmem [shape: bf16[4,128], index: 4, kind: input, shape index: {}]   ;;  %s741_s5 = inlined_call_operand.vmem [shape: f32[16,8], index: 5, kind: input, shape index: {}]   ;;  %s742_s6 = inlined_call_operand.vmem [shape: f32[1,8], index: 6, kind: input, shape index: {}]   ;;  %s743_s7 = inlined_call_operand.vmem [shape: f32[2], index: 7, kind: input, shape index: {}]   ;;  %s744_s8 = inlined_call_operand.hbm [shape: f32[8], index: 8, kind: output, shape index: {}]  }
   0x1   :  { %14 = vsyncpa [#allocation3], 0  ;;  %s34_s29 = sshll.u32 %s743_s7, 4  ;;  %s565_s30 = smov [#allocation2]   ;;  %s35_s29 = int_to_ptr.vmem [resolvable:$true] %s34_s29 }
   0x2   :  { %37 = dma.vmem_to_smem %s35_s29, 16, %s565_s30, [#allocation4]  }
   0x3   :  { %561 = dma.done.wait [#allocation4], 16  }
   0x4   :  { %562 = vsyncadd [#allocation4], 4294967280 }
   0x5   :  { %42 = sfence }
   0x6   :  { %v95_v0 = vld [vmem:[%s736_s0 + $0x10] sm:$0xff]  ;;  %vm97_vm0 = vcmask 56320   ;;  %v93_v1 = vld [vmem:[%s736_s0] sm:$0xff]  ;;  %v96_v4 = vld [vmem:[%s736_s0 + $0x18] sm:$0xff]  ;;  %v566_v25 = vmov 0.0   ;;  %vm80_vm7 = vcmask 1041408  }
   0x7   :  { %v104_v2 = vsel %vm97_vm0, %v95_v0, -inf  ;;  %v98_v3 = vsel %vm97_vm0, %v93_v1, -inf  ;;  %v94_v5 = vld [vmem:[%s736_s0 + $0x8] sm:$0xff]  ;;  %v107_v6 = vsel %vm97_vm0, %v96_v4, -inf  ;;  %v43_v8 = vld [vmem:[%s737_s1] sm:$0x3] }
   0x8   :  { %105 = vmax.xlane.f32.xlu1 %v104_v2  ;;  %99 = vmax.xlane.f32.xlu0 %v98_v3  ;;  %v101_v7 = vsel %vm97_vm0, %v94_v5, -inf  ;;  %v46_v9 = vand.u32 2147483647, %v43_v8  ;;  %v44_v14 = vld [vmem:[%s738_s2] sm:$0x1]  ;;  %v59_v23 = vmax.f32 %v43_v8, 0.0 }
   0x9   :  { %v45_v16 = vunpack.c.l.bf16 %v44_v14  ;;  %vm65_vm5 = vcmp.ge.f32.partialorder %v43_v8, 0.0  ;;  %s567_s0 = smov 121   ;;  %v182_v55 = vld [vmem:[%s739_s3] sm:$0xf]  ;;  %vm221_vm11 = vcmask 1043456   ;;  %vm285_vm12 = vcmask 64516  }
   0xa   :  { %v47_v10 = vsub.f32 0.0, %v46_v9  ;;  %v185_v56 = vand.u32 2147483647, %v182_v55  ;;  %vm200_vm9 = vcmp.ge.f32.partialorder %v182_v55, 0.0  ;;  %v183_v9 = vld [vmem:[%s740_s4] sm:$0x3] }
   0xb   :  { %v70_v21 = vsub.f32 1.0, %v45_v16  ;;  %v60_v24 = vmul.f32 %v45_v16, %v43_v8  ;;  %v74_v33 = vmul.f32 0.25, %v45_v16  ;;  %vm130_vm13 = vcmask 7168   ;;  %s143_s27 = sld [smem:[#allocation2]]  ;;  %s456_s2 = sshll.u32 %s744_s8, 4  ;;  %s457_s2 = int_to_ptr.hbm [resolvable:$true] %s456_s2 }
   0xc   :  { %v48_v11 = vmul.f32 1.442695, %v47_v10  ;;  %v186_v57 = vsub.f32 0.0, %v185_v56  ;;  %vm303_vm0 = vcmask 60416   ;;  %s471_s28 = sld [smem:[#allocation2 + $0x1]]  ;;  %s569_s8 = smov [#allocation5]  }
   0xd   :  { %v75_v34 = vmul.f32 0.75, %v70_v21  ;;  %v61_v37 = vsub.f32 %v59_v23, %v60_v24 }
   0xe   :  { %517 = vpow2.f32 %v48_v11  ;;  %v187_v58 = vmul.f32 1.442695, %v186_v57  ;;  %v652_v11 = vunpack.c.l.bf16 %v183_v9 }
   0xf   :  { %v76_v42 = vadd.f32 %v75_v34, %v74_v33 }
  0x10   :  { %108 = vmax.xlane.f32.xlu1 %v107_v6  ;;  %102 = vmax.xlane.f32.xlu0 %v101_v7  ;;  %vm208_vm10 = vcmp.eq.f32.partialorder %v652_v11, 1.0  ;;  %v214_v32 = vsub.f32 1.0, %v652_v11  ;;  %vm211_vm14 = vcmp.lt.f32.partialorder %v652_v11, 1.0 }
  0x14   :  { %v518_v15 = vpop.eup %517 }
  0x15   :  { %v50_v17 = vadd.f32 1.0, %v518_v15  ;;  %v53_v18 = vmul.f32 -0.5, %v518_v15  ;;  %v56_v20 = vand.u32 2147483647, %v518_v15 }
  0x17   :  { %519 = vlog2.f32 %v50_v17  ;;  %v54_v19 = vadd.f32 1.0, %v53_v18  ;;  %vm638_vm3 = vcmp.lt.f32.partialorder %v56_v20, 0.0004427343  ;;  %v205_v18 = vsub.f32 0.0, %v182_v55  ;;  %v666_v20 = vld [vmem:[%s741_s5 + $0x8] sm:$0xff] }
  0x18   :  { %521 = vrcp.f32 %v50_v17 }
  0x19   :  { %v55_v29 = vmul.f32 %v518_v15, %v54_v19  ;;  %523 = vpow2.f32 %v187_v58  ;;  %v661_v19 = vld [vmem:[%s741_s5] sm:$0xff]  ;;  %v206_v23 = vmin.f32 %v205_v18, 0.0 }
  0x1d   :  { %v520_v30 = vpop.eup %519 }
  0x1e   :  { %v522_v35 = vpop.eup %521  ;;  %v52_v36 = vmul.f32 0.6931472, %v520_v30 }
  0x1f   :  { %v66_v38 = vmul.f32 %v522_v35, %v518_v15  ;;  %v524_v59 = vpop.eup %523 }
  0x20   :  { %v58_v39 = vsel %vm638_vm3, %v55_v29, %v52_v36  ;;  %v189_v60 = vadd.f32 1.0, %v524_v59  ;;  %v192_v61 = vmul.f32 -0.5, %v524_v59 }
  0x21   :  { %v67_v41 = vsel %vm65_vm5, %v522_v35, %v66_v38  ;;  %v62_v44 = vadd.f32 %v61_v37, %v58_v39  ;;  %v284_v35 = vand.u32 2147483647, %v666_v20  ;;  %v215_v38 = vmul.f32 %v214_v32, %v214_v32 }
  0x22   :  { %v68_v45 = vmul.f32 %v67_v41, %v45_v16  ;;  %v69_v46 = vsub.f32 1.0, %v67_v41  ;;  %525 = vlog2.f32 %v189_v60  ;;  %v193_v62 = vadd.f32 1.0, %v192_v61 }
  0x23   :  { %v77_v50 = vmul.f32 %v76_v42, %v62_v44  ;;  %527 = vrcp.f32 %v189_v60  ;;  %v286_v37 = vsel %vm285_vm12, %v284_v35, -inf  ;;  %v216_v44 = vmul.f32 %v215_v38, %v215_v38 }
  0x24   :  { %v71_v47 = vmul.f32 %v70_v21, %v69_v46  ;;  %v194_v3 = vmul.f32 %v524_v59, %v193_v62  ;;  %v346_v21 = vmul.f32 0.5, %v661_v19 }
  0x26   :  { %v72_v49 = vadd.f32 %v71_v47, %v68_v45  ;;  %v348_v24 = vrot.slane %v346_v21, 2 }
  0x28   :  { %v73_v51 = vsub.f32 1.0, %v72_v49  ;;  %v526_v63 = vpop.eup %525  ;;  %v351_v29 = vadd.f32 %v348_v24, %v661_v19 }
  0x29   :  { %v191_v2 = vmul.f32 0.6931472, %v526_v63 }
  0x2a   :  { %v78_v52 = vmul.f32 %v77_v50, %v73_v51 }
  0x2c   :  { %v79_v53 = vmul.f32 %v78_v52, %v73_v51 }
  0x2e   :  { %v81_v54 = vsel %vm80_vm7, %v79_v53, 0.0  ;;  %vm333_vm7 = vcmask 57344  }
  0x2f   :  { %82 = vadd.xlane.f32.xlu0 %v81_v54 }
  0x7b   :  { %v106_v12 = vpop.xlane.xlu1 %105  ;;  %v100_v13 = vpop.xlane.xlu0 %99 }
  0x7c   :  { %vm110_vm1 = vcmp.ge.f32.partialorder %v100_v13, %v93_v1  ;;  %vm112_vm4 = vcmp.ge.f32.partialorder %v106_v12, %v95_v0  ;;  %v195_v0 = vand.u32 2147483647, %v524_v59  ;;  %v528_v1 = vpop.eup %527  ;;  %v472_v13 = vsel %vm208_vm10, 1.0, %v566_v25 }
  0x7d   :  { %v467_v26 = vsel %vm110_vm1, 1.0, %v566_v25  ;;  %v469_v40 = vsel %vm112_vm4, 1.0, %v566_v25  ;;  %v246_v17 = vsel %vm221_vm11, %v472_v13, 0.0 }
  0x7e   :  { %vm196_vm8 = vcmp.lt.f32.partialorder %v195_v0, 0.0004427343 }
  0x7f   :  { %v197_v6 = vsel %vm196_vm8, %v194_v3, %v191_v2 }
  0x83   :  { %v103_v22 = vpop.xlane.xlu0 %102  ;;  %v109_v27 = vpop.xlane.xlu1 %108 }
  0x84   :  { %vm111_vm2 = vcmp.ge.f32.partialorder %v103_v22, %v94_v5  ;;  %vm113_vm6 = vcmp.ge.f32.partialorder %v109_v27, %v96_v4  ;;  %v201_v4 = vmul.f32 %v528_v1, %v524_v59  ;;  %v203_v5 = vmin.f32 %v182_v55, 0.0 }
  0x85   :  { %v468_v28 = vsel %vm111_vm2, 1.0, %v566_v25  ;;  %v470_v43 = vsel %vm113_vm6, 1.0, %v566_v25  ;;  %v352_v22 = vmul.f32 0.5, %v666_v20  ;;  %v350_v27 = vsub.f32 %v661_v19, %v348_v24  ;;  %v516_v24 = vld [vmem:[%s742_s6] ss:$0 sm:$0xff] }
  0x86   :  { %v506_v31 = vpack.i.bf16 %v468_v28, %v467_v26  ;;  %v511_v48 = vpack.i.bf16 %v470_v43, %v469_v40  ;;  %v202_v7 = vsel %vm200_vm9, %v528_v1, %v201_v4  ;;  %v204_v8 = vsub.f32 %v203_v5, %v197_v6  ;;  %v688_v5 = vld [vmem:[%s742_s6] sm:$0x1] }
  0x87   :  { %v217_v10 = vsub.f32 1.0, %v202_v7  ;;  %v354_v26 = vrot.slane %v352_v22, 2  ;;  %v287_v40 = vrot.slane %v286_v37, 4  ;;  %v473_v4 = vsel %vm211_vm14, 1.0, %v566_v25 }
  0x88   :  { %507 = vrot.lane.b32.xlu2 %v506_v31, %s567_s0  ;;  %v207_v31 = vsub.f32 %v206_v23, %v197_v6  ;;  %v297_v6 = vsub.f32 %v661_v19, %v666_v20 }
  0x89   :  { %v218_v12 = vmul.f32 %v217_v10, %v204_v8  ;;  %v356_v28 = vsub.f32 %v666_v20, %v354_v26  ;;  %v357_v30 = vadd.f32 %v354_v26, %v666_v20  ;;  %v288_v42 = vmax.f32 %v286_v37, %v287_v40 }
  0x8a   :  { %v232_v39 = vmul.f32 %v207_v31, %v202_v7  ;;  %v298_v18 = vand.u32 2147483647, %v297_v6 }
  0x8b   :  { %v219_v14 = vmul.f32 %v218_v12, %v217_v10  ;;  %v394_v33 = vmin.f32 %v350_v27, %v356_v28  ;;  %v393_v34 = vmax.f32 %v351_v29, %v357_v30  ;;  %v289_v46 = vrot.slane %v288_v42, 2 }
  0x8c   :  { %v233_v45 = vmul.f32 %v232_v39, %v202_v7  ;;  %v363_v49 = vsub.f32 %v357_v30, %v356_v28  ;;  %v368_v50 = vmin.f32 %v351_v29, %v357_v30  ;;  %v369_v52 = vmax.f32 %v350_v27, %v356_v28 }
  0x8d   :  { %v220_v15 = vmul.f32 %v472_v13, %v219_v14  ;;  %v395_v36 = vsub.f32 %v393_v34, %v394_v33  ;;  %v290_v51 = vmax.f32 %v288_v42, %v289_v46  ;;  %v302_v30 = vmul.f32 %v516_v24, %v298_v18 }
  0x8e   :  { %v365_v55 = vrot.slane %v363_v49, 1  ;;  %v370_v59 = vsub.f32 %v368_v50, %v369_v52  ;;  %v234_v60 = vmul.f32 %v233_v45, %v216_v44 }
  0x8f   :  { %v222_v16 = vsel %vm221_vm11, %v220_v15, 0.0  ;;  %v396_v41 = vmax.f32 %v395_v36, 0.0  ;;  %v291_v58 = vrot.slane %v290_v51, 1  ;;  %v304_v37 = vsel %vm303_vm0, %v302_v30, 0.0 }
  0x90   :  { %512 = vrot.lane.b32.xlu2 %v511_v48, %s567_s0  ;;  %223 = vadd.xlane.f32.xlu0 %v222_v16  ;;  %v358_v48 = vsub.f32 %v351_v29, %v350_v27  ;;  %v367_v62 = vmul.f32 %v365_v55, %v363_v49  ;;  %v371_v2 = vmax.f32 %v370_v59, 0.0  ;;  %v235_v12 = vmul.f32 %v473_v4, %v234_v60 }
  0x91   :  { %v398_v43 = vrot.slane %v396_v41, 1  ;;  %v292_v1 = vmax.f32 %v290_v51, %v291_v58 }
  0x92   :  { %v360_v54 = vrot.slane %v358_v48, 1  ;;  %v373_v7 = vrot.slane %v371_v2, 1 }
  0x93   :  { %v676_v47 = vmul.f32 %v398_v43, %v396_v41  ;;  %vm293_vm15 = vcmp.gt.f32.partialorder %v292_v1, 0.0 }
  0x94   :  { %v362_v61 = vmul.f32 %v360_v54, %v358_v48  ;;  %v474_v9 = vsel %vm293_vm15, 1.0, %v566_v25  ;;  %v375_v11 = vmul.f32 %v373_v7, %v371_v2  ;;  %v236_v25 = vsel %vm221_vm11, %v235_v12, 0.0 }
  0x95   :  { %529 = vrcp.f32 %v676_v47  ;;  %v296_v13 = vmul.f32 %v474_v9, %v688_v5  ;;  %vm407_vm1 = vweird.f32 %v676_v47  ;;  %v411_v32 = vand.u32 2147483647, %v676_v47 }
  0x96   :  { %v376_v10 = vadd.f32 %v367_v62, %v362_v61  ;;  %v413_v33 = vand.u32 2147483648, %v676_v47  ;;  %v568_v7 = vmov 2.0  }
  0x97   :  { %v316_v21 = vperm.slane %v296_v13, 0  ;;  %vm412_vm5 = vcmp.eq.f32.partialorder %v411_v32, 8.507059e+37  ;;  %v334_v50 = vsel %vm333_vm7, %v296_v13, 0.0 }
  0x98   :  { %247 = vadd.xlane.f32.xlu0 %v246_v17  ;;  %v377_v22 = vsub.f32 %v376_v10, %v375_v11  ;;  %v414_v40 = vor.u32 1.1754944e-38, %v413_v33 }
  0x99   :  { %v317_v26 = vmul.f32 %v316_v21, %v298_v18 }
  0x9a   :  { %531 = vrcp.f32 %v377_v22  ;;  %vm383_vm4 = vweird.f32 %v377_v22  ;;  %v389_v39 = vand.u32 2147483648, %v377_v22  ;;  %v387_v42 = vand.u32 2147483647, %v377_v22 }
  0x9b   :  { %v530_v8 = vpop.eup %529  ;;  %v319_v28 = vrot.slane %v317_v26, 4  ;;  %v401_v45 = vsub.f32 %v676_v47, %v377_v22  ;;  %533 = vrcp.f32 %v568_v7 }
  0x9c   :  { %v403_v14 = vmul.f32 %v530_v8, %v676_v47  ;;  %vm408_vm2 = vweird.f32 %v530_v8  ;;  %v390_v46 = vor.u32 1.1754944e-38, %v389_v39  ;;  %vm388_vm9 = vcmp.eq.f32.partialorder %v387_v42, 8.507059e+37 }
  0x9d   :  { %v321_v31 = vsel %vm303_vm0, %v319_v28, 0.0  ;;  %vm704_vm3 = vmor %vm407_vm1, %vm408_vm2 }
  0x9e   :  { %v404_v19 = vsub.f32 1.0, %v403_v14 }
  0xa0   :  { %v405_v29 = vmul.f32 %v530_v8, %v404_v19  ;;  %322 = vadd.xlane.f32.xlu0 %v321_v31  ;;  %v532_v35 = vpop.eup %531 }
  0xa1   :  { %v379_v38 = vmul.f32 %v532_v35, %v377_v22  ;;  %vm384_vm6 = vweird.f32 %v532_v35 }
  0xa2   :  { %v406_v34 = vadd.f32 %v530_v8, %v405_v29  ;;  %vm385_vm8 = vmor %vm383_vm4, %vm384_vm6  ;;  %v83_v62 = vpop.xlane.xlu0 %82 }
  0xa3   :  { %v380_v41 = vsub.f32 1.0, %v379_v38 }
  0xa4   :  { %v410_v43 = vsel %vm704_vm3, %v530_v8, %v406_v34  ;;  %v534_v8 = vpop.eup %533 }
  0xa5   :  { %v381_v44 = vmul.f32 %v532_v35, %v380_v41  ;;  %v415_v48 = vsel %vm412_vm5, %v414_v40, %v410_v43  ;;  %v172_v14 = vmul.f32 2.0, %v534_v8  ;;  %vm176_vm10 = vweird.f32 %v534_v8 }
  0xa6   :  { %v416_v52 = vmul.f32 %v415_v48, %v401_v45 }
  0xa7   :  { %v382_v49 = vadd.f32 %v532_v35, %v381_v44  ;;  %v173_v21 = vsub.f32 1.0, %v172_v14 }
  0xa9   :  { %v386_v51 = vsel %vm385_vm8, %v532_v35, %v382_v49  ;;  %v174_v30 = vmul.f32 %v534_v8, %v173_v21 }
  0xab   :  { %v175_v35 = vadd.f32 %v534_v8, %v174_v30 }
  0xad   :  { %v177_v42 = vsel %vm176_vm10, %v534_v8, %v175_v35 }
  0xe2   :  { %v508_v53 = vpop.permute.xlu2 %507 }
  0xe3   :  { %v510_v56 = vunpack.i.h.bf16 %v508_v53  ;;  %v509_v57 = vunpack.i.l.bf16 %v508_v53  ;;  %v391_v53 = vsel %vm388_vm9, %v390_v46, %v386_v51 }
  0xe4   :  { %v392_v54 = vmul.f32 %v391_v53, %v375_v11 }
  0xe5   :  { %v131_v63 = vsel %vm130_vm13, %v509_v57, 0.0  ;;  %v132_v0 = vsel %vm130_vm13, %v510_v56, 0.0  ;;  %v433_v56 = vrot.slane %v296_v13, 4 }
  0xe6   :  { %v133_v3 = vadd.f32 %v132_v0, %v131_v63  ;;  %v417_v55 = vsub.f32 %v392_v54, %v416_v52  ;;  %v84_v63 = vrot.slane %v83_v62, 4 }
  0xe8   :  { %134 = vadd.xlane.f32.xlu1 %v133_v3  ;;  %v418_v57 = vsub.f32 1.0, %v417_v55  ;;  %v85_v0 = vadd.f32 %v84_v63, %v83_v62 }
  0xea   :  { %v513_v15 = vpop.permute.xlu2 %512  ;;  %v435_v58 = vmul.f32 %v433_v56, %v418_v57  ;;  %v419_v59 = vmul.f32 %v418_v57, %v688_v5  ;;  %v86_v1 = vrot.slane %v85_v0, 2 }
  0xeb   :  { %v515_v16 = vunpack.i.h.bf16 %v513_v15  ;;  %v514_v17 = vunpack.i.l.bf16 %v513_v15 }
  0xec   :  { %v437_v47 = vrot.slane %v435_v58, 4  ;;  %v420_v60 = vsel %vm333_vm7, %v419_v59, 0.0  ;;  %v87_v2 = vadd.f32 %v86_v1, %v85_v0 }
  0xed   :  { %v155_v20 = vsel %vm130_vm13, %v514_v17, 0.0  ;;  %v156_v23 = vsel %vm130_vm13, %v515_v16, 0.0  ;;  %421 = vadd.xlane.f32.xlu0 %v420_v60 }
  0xee   :  { %v157_v27 = vadd.f32 %v156_v23, %v155_v20  ;;  %v439_v61 = vsel %vm333_vm7, %v437_v47, 0.0  ;;  %v88_v3 = vrot.slane %v87_v2, 1 }
  0xf0   :  { %158 = vadd.xlane.f32.xlu2 %v157_v27  ;;  %237 = vadd.xlane.f32.xlu1 %v236_v25  ;;  %v89_v4 = vadd.f32 %v88_v3, %v87_v2 }
  0xf2   :  { %475 = vpush %v89_v4 }
  0xf8   :  { %305 = vadd.xlane.f32.xlu1 %v304_v37 }
 0x100   :  { %335 = vadd.xlane.f32.xlu1 %v334_v50 }
 0x103   :  { %v224_v6 = vpop.xlane.xlu0 %223 }
 0x104   :  { %v225_v10 = vrot.slane %v224_v6, 4 }
 0x106   :  { %v226_v15 = vadd.f32 %v225_v10, %v224_v6 }
 0x108   :  { %440 = vadd.xlane.f32.xlu1 %v439_v61  ;;  %v227_v20 = vrot.slane %v226_v15, 2 }
 0x10a   :  { %v228_v33 = vadd.f32 %v227_v20, %v226_v15 }
 0x10b   :  { %v248_v5 = vpop.xlane.xlu0 %247 }
 0x10c   :  { %v249_v13 = vrot.slane %v248_v5, 4  ;;  %v229_v39 = vrot.slane %v228_v33, 1 }
 0x10e   :  { %v250_v17 = vadd.f32 %v249_v13, %v248_v5  ;;  %v230_v45 = vadd.f32 %v229_v39, %v228_v33 }
 0x110   :  { %v251_v26 = vrot.slane %v250_v17, 2 }
 0x112   :  { %v252_v37 = vadd.f32 %v251_v26, %v250_v17 }
 0x113   :  { %v323_v49 = vpop.xlane.xlu0 %322 }
 0x114   :  { %v253_v43 = vrot.slane %v252_v37, 1  ;;  %v324_v53 = vrot.slane %v323_v49, 4 }
 0x116   :  { %v254_v46 = vadd.f32 %v253_v43, %v252_v37  ;;  %v325_v47 = vadd.f32 %v324_v53, %v323_v49 }
 0x118   :  { %v326_v0 = vrot.slane %v325_v47, 2 }
 0x11a   :  { %v327_v8 = vadd.f32 %v326_v0, %v325_v47 }
 0x11c   :  { %v328_v17 = vrot.slane %v327_v8, 1 }
 0x123   :  { %s476_s6 = spop %475 }
 0x124   :  { %92 = sst [smem:[#allocation5]] %s476_s6 }
 0x15b   :  { %v135_v9 = vpop.xlane.xlu1 %134 }
 0x15c   :  { %v136_v12 = vrot.slane %v135_v9, 4 }
 0x15e   :  { %v137_v11 = vadd.f32 %v136_v12, %v135_v9 }
 0x160   :  { %v138_v16 = vrot.slane %v137_v11, 2  ;;  %v422_v52 = vpop.xlane.xlu0 %421 }
 0x161   :  { %v423_v57 = vrot.slane %v422_v52, 4 }
 0x162   :  { %v139_v18 = vadd.f32 %v138_v16, %v137_v11 }
 0x163   :  { %v159_v22 = vpop.xlane.xlu2 %158  ;;  %v238_v19 = vpop.xlane.xlu1 %237  ;;  %v424_v61 = vadd.f32 %v423_v57, %v422_v52 }
 0x164   :  { %v160_v23 = vrot.slane %v159_v22, 4  ;;  %v239_v25 = vrot.slane %v238_v19, 4  ;;  %v140_v24 = vrot.slane %v139_v18, 1 }
 0x165   :  { %v425_v4 = vrot.slane %v424_v61, 2 }
 0x166   :  { %v161_v27 = vadd.f32 %v160_v23, %v159_v22  ;;  %v240_v28 = vadd.f32 %v239_v25, %v238_v19  ;;  %v141_v29 = vadd.f32 %v140_v24, %v139_v18  ;;  %v329_v24 = vadd.f32 %v328_v17, %v327_v8 }
 0x167   :  { %v426_v12 = vadd.f32 %v425_v4, %v424_v61 }
 0x168   :  { %v162_v31 = vrot.slane %v161_v27, 2  ;;  %v241_v32 = vrot.slane %v240_v28, 2  ;;  %477 = vpush %v141_v29 }
 0x169   :  { %v427_v19 = vrot.slane %v426_v12, 1 }
 0x16a   :  { %v163_v34 = vadd.f32 %v162_v31, %v161_v27  ;;  %v242_v36 = vadd.f32 %v241_v32, %v240_v28 }
 0x16b   :  { %v306_v48 = vpop.xlane.xlu1 %305  ;;  %v428_v27 = vadd.f32 %v427_v19, %v426_v12 }
 0x16c   :  { %v164_v38 = vrot.slane %v163_v34, 1  ;;  %v243_v40 = vrot.slane %v242_v36, 1  ;;  %v307_v51 = vrot.slane %v306_v48, 4 }
 0x16e   :  { %v165_v41 = vadd.f32 %v164_v38, %v163_v34  ;;  %v244_v44 = vadd.f32 %v243_v40, %v242_v36  ;;  %v308_v58 = vadd.f32 %v307_v51, %v306_v48 }
 0x170   :  { %479 = vpush %v165_v41  ;;  %v309_v62 = vrot.slane %v308_v58, 2 }
 0x171   :  { %481 = vpush %v177_v42 }
 0x172   :  { %483 = vpush %v230_v45  ;;  %v310_v7 = vadd.f32 %v309_v62, %v308_v58 }
 0x173   :  { %485 = vpush %v244_v44  ;;  %v336_v50 = vpop.xlane.xlu1 %335 }
 0x174   :  { %487 = vpush %v254_v46  ;;  %v337_v55 = vrot.slane %v336_v50, 4  ;;  %v311_v15 = vrot.slane %v310_v7, 1 }
 0x176   :  { %v338_v60 = vadd.f32 %v337_v55, %v336_v50  ;;  %v312_v23 = vadd.f32 %v311_v15, %v310_v7 }
 0x178   :  { %v339_v2 = vrot.slane %v338_v60, 2 }
 0x17a   :  { %v340_v10 = vadd.f32 %v339_v2, %v338_v60 }
 0x17b   :  { %v441_v54 = vpop.xlane.xlu1 %440 }
 0x17c   :  { %v442_v59 = vrot.slane %v441_v54, 4  ;;  %v341_v21 = vrot.slane %v340_v10, 1 }
 0x17e   :  { %v443_v63 = vadd.f32 %v442_v59, %v441_v54  ;;  %v342_v26 = vadd.f32 %v341_v21, %v340_v10 }
 0x180   :  { %v444_v6 = vrot.slane %v443_v63, 2 }
 0x182   :  { %v445_v14 = vadd.f32 %v444_v6, %v443_v63 }
 0x184   :  { %v446_v25 = vrot.slane %v445_v14, 1 }
 0x186   :  { %v447_v28 = vadd.f32 %v446_v25, %v445_v14 }
 0x199   :  { %s478_s29 = spop %477 }
 0x19a   :  { %s144_s30 = ssub.f32 %s478_s29, %s143_s27 }
 0x19c   :  { %s145_s12 = sand.u32 2147483647, %s144_s30 }
 0x1a1   :  { %s480_s9 = spop %479 }
 0x1a2   :  { %s168_s10 = ssub.f32 %s480_s9, %s471_s28  ;;  %s482_s11 = spop %481 }
 0x1a3   :  { %s715_s7 = spop %483 }
 0x1a4   :  { %s169_s13 = sand.u32 2147483647, %s168_s10  ;;  %s717_s14 = spop %485 }
 0x1a5   :  { %s170_s15 = sadd.f32 %s169_s13, %s145_s12  ;;  %s719_s16 = spop %487 }
 0x1a6   :  { %s258_s17 = sadd.f32 %s717_s14, %s715_s7  ;;  %p256_p0 = scmp.gt.f32.partialorder %s719_s16, 0.0 }
 0x1a7   :  { %s179_s18 = smul.f32 %s482_s11, %s170_s15  ;;  %s277_s20 = ssub.f32 0.0, %s717_s14 }
 0x1a8   :  { %s257_s19 = scalar_select %p256_p0, %s719_s16, 1.0 }
 0x1a9   :  { %181 = sst [smem:[#allocation5 + $0x1]] %s179_s18 }
 0x1aa   :  { %v260_v56 = vstv %s257_s19  ;;  %s259_s3 = ssub.f32 0.0, %s258_s17 }
 0x1ab   :  { %535 = vrcp.f32 %v260_v56  ;;  %v272_v9 = vand.u32 2147483648, %v260_v56  ;;  %v270_v11 = vand.u32 2147483647, %v260_v56  ;;  %vm266_vm12 = vweird.f32 %v260_v56 }
 0x1ad   :  { %v273_v18 = vor.u32 1.1754944e-38, %v272_v9  ;;  %vm271_vm14 = vcmp.eq.f32.partialorder %v270_v11, 8.507059e+37 }
 0x1b1   :  { %v536_v1 = vpop.eup %535 }
 0x1b2   :  { %v262_v3 = vmul.f32 %v536_v1, %v260_v56  ;;  %vm267_vm11 = vweird.f32 %v536_v1 }
 0x1b3   :  { %vm268_vm13 = vmor %vm266_vm12, %vm267_vm11 }
 0x1b4   :  { %v263_v5 = vsub.f32 1.0, %v262_v3 }
 0x1b6   :  { %v264_v13 = vmul.f32 %v536_v1, %v263_v5 }
 0x1b8   :  { %v265_v16 = vadd.f32 %v536_v1, %v264_v13 }
 0x1ba   :  { %v269_v22 = vsel %vm268_vm13, %v536_v1, %v265_v16 }
 0x1bb   :  { %v274_v20 = vsel %vm271_vm14, %v273_v18, %v269_v22 }
 0x1bc   :  { %489 = vpush %v274_v20 }
 0x1bd   :  { %491 = vpush %v312_v23 }
 0x1be   :  { %493 = vpush %v329_v24 }
 0x1bf   :  { %495 = vpush %v342_v26 }
 0x1c0   :  { %497 = vpush %v428_v27 }
 0x1c1   :  { %499 = vpush %v447_v28 }
 0x1ed   :  { %s490_s21 = spop %489 }
 0x1ee   :  { %s276_s4 = smul.f32 %s490_s21, %s259_s3  ;;  %s492_s22 = spop %491 }
 0x1ef   :  { %315 = sst [smem:[#allocation5 + $0x3]] %s492_s22  ;;  %s494_s23 = spop %493 }
 0x1f0   :  { %s750_s4 = smov (!%p256_p0, %s276_s4), %s277_s20  ;;  %332 = sst [smem:[#allocation5 + $0x4]] %s494_s23 }
 0x1f1   :  { %s496_s5 = spop %495  ;;  %280 = sst [smem:[#allocation5 + $0x2]] %s750_s4 }
 0x1f2   :  { %s498_s24 = spop %497  ;;  %345 = sst [smem:[#allocation5 + $0x5]] %s496_s5 }
 0x1f3   :  { %s500_s25 = spop %499  ;;  %431 = sst [smem:[#allocation5 + $0x6]] %s498_s24 }
 0x1f4   :  { %450 = sst [smem:[#allocation5 + $0x7]] %s500_s25 }
 0x1f5   :  { %459 = dma.smem_to_hbm %s569_s8, 16, %s457_s2, [#allocation3]  }
 0x1f6   :  { %563 = dma.done.wait [#allocation3], 16  }
 0x1f7   :  { %564 = vsyncadd [#allocation3], 4294967280 }
 0x1f8   :  { %464 = sfence }
 0x1f9   :  { %465 = vsyncpa [#allocation3], 1 }
 0x1fa   :  { %466 = vsyncpa [#allocation4], 1 }

</bundles_post_ra>
